<compile_context>
chip_gen: v5e
topology: v5e:2x2
jax: 0.10.0
libtpu: 0.0.40
codegen_flags: <defaults>
</compile_context>

<pallas_src>
import jax
import jax.numpy as jnp
from jax.experimental import pallas as pl
from jax.experimental.pallas import tpu as pltpu

NUM_CATEGORIES = 14
HIDDEN_DIM = 128
TEXT_EMBEDDING_DIM = 384

OUT_PAD = 128          # lane-dense padded output width (>= NUM_CATEGORIES)
MAX_BATCH_TILE = 4096  # f32 x tile = 6 MB -> ~15 MB total w/ double buffers
ROW_ALIGN = 128        # batch rounded up only to this (MXU row tile)
VMEM_LIMIT_BYTES = 32 * 1024 * 1024  # explicit: > v5e's 16 MiB scoped default,
                                     # well inside v7x's 64 MiB physical VMEM


def _round_up(n, m):
    return ((n + m - 1) // m) * m


def _round_down(n, m):
    return (n // m) * m


def _choose_batch_tile(b_pad):
    """Pick the batch tile (multiple of 128).

    For batches that fit in one 128-row tile, use it directly. Otherwise aim
    for roughly half the (128-rounded) batch so the grid has >= 2 steps and
    v7x can shard tiles across both TensorCores, capped at MAX_BATCH_TILE.
    """
    if b_pad <= ROW_ALIGN:
        return b_pad
    half = max(ROW_ALIGN, _round_down(b_pad // 2, ROW_ALIGN))
    return min(MAX_BATCH_TILE, half)


def _mlp_kernel(x_ref, w1_ref, b1_ref, w2_ref, b2_ref, w3_ref, b3_ref, o_ref):
    """Fused 3-layer MLP on one (TB, 384) batch tile.

    bf16 matmul operands (input cast in-kernel), f32 accumulation via
    preferred_element_type, f32 elementwise epilogue (bias add / ReLU),
    bf16 lane-dense output.
    """
    # In-kernel cast: avoids a separate wrapper-side HBM pass over x.
    x = x_ref[...].astype(jnp.bfloat16)              # (TB, 384)

    # Layer 1: Linear(384 -> 128) + ReLU
    h1 = jnp.dot(x, w1_ref[...], preferred_element_type=jnp.float32)
    h1 = jnp.maximum(h1 + b1_ref[...], 0.0)          # f32 epilogue
    h1 = h1.astype(jnp.bfloat16)

    # Layer 2: Linear(128 -> 128) + ReLU
    h2 = jnp.dot(h1, w2_ref[...], preferred_element_type=jnp.float32)
    h2 = jnp.maximum(h2 + b2_ref[...], 0.0)
    h2 = h2.astype(jnp.bfloat16)

    # Output layer: Linear(128 -> 128-padded); columns >= 14 are zeros.
    out = jnp.dot(h2, w3_ref[...], preferred_element_type=jnp.float32)
    o_ref[...] = (out + b3_ref[...]).astype(o_ref.dtype)   # bf16 writeback


def text_category_model_forward(x, params):
    """Run the fused MLP forward pass as a batch-tiled Pallas TPU kernel.

    Args:
      x: (B, 384) float32 (or bfloat16) text embeddings.
      params: dict produced by `prepare_params` with bf16 weights in (in, out)
              layout, f32 biases, and W3/b3 zero-padded to 128 output columns.
    Returns:
      (B, 14) float32 logits.
    """
    B = x.shape[0]

    # Pad the batch only up to the 128-row MXU tile (at most 127 dead rows).
    b_pad = _round_up(max(B, ROW_ALIGN), ROW_ALIGN)
    if b_pad != B:
        x = jnp.pad(x, ((0, b_pad - B), (0, 0)))     # keeps caller dtype

    tb = _choose_batch_tile(b_pad)
    grid = (pl.cdiv(b_pad, tb),)                     # ragged last block is masked

    def _const(i):           # weights/biases: same block for every grid step
        return (0, 0)

    out_padded = pl.pallas_call(
        _mlp_kernel,
        out_shape=jax.ShapeDtypeStruct((b_pad, OUT_PAD), jnp.bfloat16),
        grid=grid,
        in_specs=[
            pl.BlockSpec((tb, TEXT_EMBEDDING_DIM), lambda i: (i, 0)),  # x tile
            pl.BlockSpec((TEXT_EMBEDDING_DIM, HIDDEN_DIM), _const),    # W1
            pl.BlockSpec((1, HIDDEN_DIM), _const),                     # b1
            pl.BlockSpec((HIDDEN_DIM, HIDDEN_DIM), _const),            # W2
            pl.BlockSpec((1, HIDDEN_DIM), _const),                     # b2
            pl.BlockSpec((HIDDEN_DIM, OUT_PAD), _const),               # W3 (padded)
            pl.BlockSpec((1, OUT_PAD), _const),                        # b3 (padded)
        ],
        out_specs=pl.BlockSpec((tb, OUT_PAD), lambda i: (i, 0)),
        compiler_params=pltpu.CompilerParams(
            dimension_semantics=("parallel",),
            vmem_limit_bytes=VMEM_LIMIT_BYTES),
    )(
        x,
        params["w1"], params["b1"],
        params["w2"], params["b2"],
        params["w3_pad"], params["b3_pad"],
    )
    return out_padded[:B, :NUM_CATEGORIES].astype(jnp.float32)


def init_params(key):
    """Deterministic f32 init mimicking PyTorch Linear default (U[-1/sqrt(fan_in), +])."""
    ks = jax.random.split(key, 6)

    def linear(kw, kb, fan_in, fan_out):
        bound = 1.0 / jnp.sqrt(jnp.float32(fan_in))
        # Stored as (in, out): equivalent to PyTorch's (out, in) weight, transposed.
        w = jax.random.uniform(kw, (fan_in, fan_out), jnp.float32, -bound, bound)
        b = jax.random.uniform(kb, (1, fan_out), jnp.float32, -bound, bound)
        return w, b

    w1, b1 = linear(ks[0], ks[1], TEXT_EMBEDDING_DIM, HIDDEN_DIM)
    w2, b2 = linear(ks[2], ks[3], HIDDEN_DIM, HIDDEN_DIM)
    w3, b3 = linear(ks[4], ks[5], HIDDEN_DIM, NUM_CATEGORIES)
    return {"w1": w1, "b1": b1, "w2": w2, "b2": b2, "w3": w3, "b3": b3}


def prepare_params(params_f32):
    """Convert f32 reference params to the kernel layout:
    bf16 weights, f32 biases, W3/b3 zero-padded to 128 output columns."""
    w3_pad = jnp.zeros((HIDDEN_DIM, OUT_PAD), jnp.float32)
    w3_pad = w3_pad.at[:, :NUM_CATEGORIES].set(params_f32["w3"])
    b3_pad = jnp.zeros((1, OUT_PAD), jnp.float32)
    b3_pad = b3_pad.at[:, :NUM_CATEGORIES].set(params_f32["b3"])
    return {
        "w1": params_f32["w1"].astype(jnp.bfloat16),
        "b1": params_f32["b1"].astype(jnp.float32),
        "w2": params_f32["w2"].astype(jnp.bfloat16),
        "b2": params_f32["b2"].astype(jnp.float32),
        "w3_pad": w3_pad.astype(jnp.bfloat16),
        "b3_pad": b3_pad.astype(jnp.float32),
    }


def reference_forward(x, params):
    """Pure-JAX f32 reference for correctness checking."""
    h1 = jnp.maximum(x @ params["w1"] + params["b1"], 0.0)
    h2 = jnp.maximum(h1 @ params["w2"] + params["b2"], 0.0)
    return h2 @ params["w3"] + params["b3"]


if __name__ == "__main__":
    key = jax.random.PRNGKey(0)
    k_params, k_x = jax.random.split(key)

    params_f32 = init_params(k_params)
    params_kernel = prepare_params(params_f32)

    batch = 8
    x = jax.random.normal(k_x, (batch, TEXT_EMBEDDING_DIM), jnp.float32)

    out = text_category_model_forward(x, params_kernel)
    out = jax.block_until_ready(out)

    ref = reference_forward(x, params_f32)
    assert out.shape == (batch, NUM_CATEGORIES)
    # bf16 matmul operands (f32 accumulation) + bf16 logit writeback ->
    # loosened tolerance vs the all-f32 reference.
    assert jnp.allclose(out, ref, atol=5e-2, rtol=5e-2), "Pallas output mismatch vs reference"

    print("KERNEL_OK")
</pallas_src>

<mosaic_0001>
module attributes {stable_mosaic.version = 11 : i64} {
  func.func @_mlp_kernel(%arg0: i32, %arg1: memref<128x384xf32, #tpu.memory_space<vmem>>, %arg2: memref<384x128xbf16, #tpu.memory_space<vmem>>, %arg3: memref<1x128xf32, #tpu.memory_space<vmem>>, %arg4: memref<128x128xbf16, #tpu.memory_space<vmem>>, %arg5: memref<1x128xf32, #tpu.memory_space<vmem>>, %arg6: memref<128x128xbf16, #tpu.memory_space<vmem>>, %arg7: memref<1x128xf32, #tpu.memory_space<vmem>>, %arg8: memref<128x128xbf16, #tpu.memory_space<vmem>>) attributes {dimension_semantics = [#tpu.dimension_semantics<parallel>], iteration_bounds = array<i64: 1>, scalar_prefetch = 0 : i64, scratch_operands = 0 : i64, tpu.core_type = #tpu.core_type<tc>, window_params = [{transform_indices = @transform_0, window_bounds = array<i64: 128, 384>}, {pipeline_mode = #tpu.pipeline_mode<synchronous>, transform_indices = @transform_1, window_bounds = array<i64: 384, 128>}, {pipeline_mode = #tpu.pipeline_mode<synchronous>, transform_indices = @transform_2, window_bounds = array<i64: 1, 128>}, {pipeline_mode = #tpu.pipeline_mode<synchronous>, transform_indices = @transform_3, window_bounds = array<i64: 128, 128>}, {pipeline_mode = #tpu.pipeline_mode<synchronous>, transform_indices = @transform_4, window_bounds = array<i64: 1, 128>}, {pipeline_mode = #tpu.pipeline_mode<synchronous>, transform_indices = @transform_5, window_bounds = array<i64: 128, 128>}, {pipeline_mode = #tpu.pipeline_mode<synchronous>, transform_indices = @transform_6, window_bounds = array<i64: 1, 128>}, {transform_indices = @transform_7, window_bounds = array<i64: 128, 128>}]} {
    %c0 = arith.constant 0 : index
    %c0_0 = arith.constant 0 : index
    %0 = vector.load %arg1[%c0, %c0_0] : memref<128x384xf32, #tpu.memory_space<vmem>>, vector<128x384xf32>
    %1 = arith.truncf %0 : vector<128x384xf32> to vector<128x384xbf16>
    %c0_1 = arith.constant 0 : index
    %c0_2 = arith.constant 0 : index
    %2 = vector.load %arg2[%c0_1, %c0_2] : memref<384x128xbf16, #tpu.memory_space<vmem>>, vector<384x128xbf16>
    %cst = arith.constant dense<0.000000e+00> : vector<128x128xf32>
    %3 = tpu.matmul %1, %2, %cst {dimension_numbers = #tpu.dot_dimension_numbers<[1], [0], [0], [1], [0, 0, 1, 1], [], []>} : vector<128x384xbf16>, vector<384x128xbf16>, vector<128x128xf32> -> vector<128x128xf32>
    %c0_3 = arith.constant 0 : index
    %c0_4 = arith.constant 0 : index
    %4 = vector.load %arg3[%c0_3, %c0_4] : memref<1x128xf32, #tpu.memory_space<vmem>>, vector<1x128xf32>
    %5 = vector.broadcast %4 : vector<1x128xf32> to vector<128x128xf32>
    %6 = arith.addf %3, %5 : vector<128x128xf32>
    %cst_5 = arith.constant 0.000000e+00 : f32
    %7 = vector.broadcast %cst_5 : f32 to vector<128x128xf32>
    %8 = arith.maximumf %6, %7 : vector<128x128xf32>
    %9 = arith.truncf %8 : vector<128x128xf32> to vector<128x128xbf16>
    %c0_6 = arith.constant 0 : index
    %c0_7 = arith.constant 0 : index
    %10 = vector.load %arg4[%c0_6, %c0_7] : memref<128x128xbf16, #tpu.memory_space<vmem>>, vector<128x128xbf16>
    %cst_8 = arith.constant dense<0.000000e+00> : vector<128x128xf32>
    %11 = tpu.matmul %9, %10, %cst_8 {dimension_numbers = #tpu.dot_dimension_numbers<[1], [0], [0], [1], [0, 0, 1, 1], [], []>} : vector<128x128xbf16>, vector<128x128xbf16>, vector<128x128xf32> -> vector<128x128xf32>
    %c0_9 = arith.constant 0 : index
    %c0_10 = arith.constant 0 : index
    %12 = vector.load %arg5[%c0_9, %c0_10] : memref<1x128xf32, #tpu.memory_space<vmem>>, vector<1x128xf32>
    %13 = vector.broadcast %12 : vector<1x128xf32> to vector<128x128xf32>
    %14 = arith.addf %11, %13 : vector<128x128xf32>
    %cst_11 = arith.constant 0.000000e+00 : f32
    %15 = vector.broadcast %cst_11 : f32 to vector<128x128xf32>
    %16 = arith.maximumf %14, %15 : vector<128x128xf32>
    %17 = arith.truncf %16 : vector<128x128xf32> to vector<128x128xbf16>
    %c0_12 = arith.constant 0 : index
    %c0_13 = arith.constant 0 : index
    %18 = vector.load %arg6[%c0_12, %c0_13] : memref<128x128xbf16, #tpu.memory_space<vmem>>, vector<128x128xbf16>
    %cst_14 = arith.constant dense<0.000000e+00> : vector<128x128xf32>
    %19 = tpu.matmul %17, %18, %cst_14 {dimension_numbers = #tpu.dot_dimension_numbers<[1], [0], [0], [1], [0, 0, 1, 1], [], []>} : vector<128x128xbf16>, vector<128x128xbf16>, vector<128x128xf32> -> vector<128x128xf32>
    %c0_15 = arith.constant 0 : index
    %c0_16 = arith.constant 0 : index
    %20 = vector.load %arg7[%c0_15, %c0_16] : memref<1x128xf32, #tpu.memory_space<vmem>>, vector<1x128xf32>
    %21 = vector.broadcast %20 : vector<1x128xf32> to vector<128x128xf32>
    %22 = arith.addf %19, %21 : vector<128x128xf32>
    %23 = arith.truncf %22 : vector<128x128xf32> to vector<128x128xbf16>
    %c0_17 = arith.constant 0 : index
    %c0_18 = arith.constant 0 : index
    %24 = vector.load %arg8[%c0_17, %c0_18] : memref<128x128xbf16, #tpu.memory_space<vmem>>, vector<128x128xbf16>
    tpu.vector_store %arg8[%c0_17, %c0_18], %23 {strides = array<i32>} : memref<128x128xbf16, #tpu.memory_space<vmem>>, vector<128x128xbf16>,
    return
  }
  func.func @transform_0(%arg0: i32) -> (i32, i32) {
    %c0_i32 = arith.constant 0 : i32
    %c0_i32_0 = arith.constant 0 : i32
    return %arg0, %c0_i32 : i32, i32
  }
  func.func @transform_1(%arg0: i32) -> (i32, i32) {
    %c0_i32 = arith.constant 0 : i32
    %c0_i32_0 = arith.constant 0 : i32
    %c0_i32_1 = arith.constant 0 : i32
    return %c0_i32, %c0_i32_0 : i32, i32
  }
  func.func @transform_2(%arg0: i32) -> (i32, i32) {
    %c0_i32 = arith.constant 0 : i32
    %c0_i32_0 = arith.constant 0 : i32
    %c0_i32_1 = arith.constant 0 : i32
    return %c0_i32, %c0_i32_0 : i32, i32
  }
  func.func @transform_3(%arg0: i32) -> (i32, i32) {
    %c0_i32 = arith.constant 0 : i32
    %c0_i32_0 = arith.constant 0 : i32
    %c0_i32_1 = arith.constant 0 : i32
    return %c0_i32, %c0_i32_0 : i32, i32
  }
  func.func @transform_4(%arg0: i32) -> (i32, i32) {
    %c0_i32 = arith.constant 0 : i32
    %c0_i32_0 = arith.constant 0 : i32
    %c0_i32_1 = arith.constant 0 : i32
    return %c0_i32, %c0_i32_0 : i32, i32
  }
  func.func @transform_5(%arg0: i32) -> (i32, i32) {
    %c0_i32 = arith.constant 0 : i32
    %c0_i32_0 = arith.constant 0 : i32
    %c0_i32_1 = arith.constant 0 : i32
    return %c0_i32, %c0_i32_0 : i32, i32
  }
  func.func @transform_6(%arg0: i32) -> (i32, i32) {
    %c0_i32 = arith.constant 0 : i32
    %c0_i32_0 = arith.constant 0 : i32
    %c0_i32_1 = arith.constant 0 : i32
    return %c0_i32, %c0_i32_0 : i32, i32
  }
  func.func @transform_7(%arg0: i32) -> (i32, i32) {
    %c0_i32 = arith.constant 0 : i32
    %c0_i32_0 = arith.constant 0 : i32
    return %arg0, %c0_i32 : i32, i32
  }
}

</mosaic_0001>

<bundles_post_ra>
// kernel: tpu_custom_call.1
= control target key start
LH: loop header
LB: loop body
LE: loop exit
PB: predicated region body
PF: predicated region fallthrough
CT: control target
= control target key end

     0   :  { %12 = vsyncpa [#allocation3], 0  ;;  %s1369_s0 = inlined_call_operand.hbm [shape: f32[128,384], index: 0, kind: input, shape index: {}]   ;;  %s1370_s1 = inlined_call_operand.hbm [shape: bf16[384,128], index: 1, kind: input, shape index: {}]   ;;  %s1371_s2 = inlined_call_operand.vmem [shape: f32[1,128], index: 2, kind: input, shape index: {}]   ;;  %s1372_s3 = inlined_call_operand.hbm [shape: bf16[128,128], index: 3, kind: input, shape index: {}]   ;;  %s1373_s4 = inlined_call_operand.vmem [shape: f32[1,128], index: 4, kind: input, shape index: {}]   ;;  %s1374_s5 = inlined_call_operand.hbm [shape: bf16[128,128], index: 5, kind: input, shape index: {}]   ;;  %s1375_s6 = inlined_call_operand.vmem [shape: f32[1,128], index: 6, kind: input, shape index: {}]   ;;  %s1376_s7 = inlined_call_operand.hbm [shape: bf16[128,128], index: 7, kind: output, shape index: {}]  }
   0x1   :  { %13 = vsyncpa [#allocation6], 0 }
   0x2   :  { %14 = vsyncpa [#allocation9], 0  ;;  %s33_s26 = sshll.u32 %s1370_s1, 4  ;;  %s34_s26 = int_to_ptr.hbm [resolvable:$true] %s33_s26 }
   0x3   :  { %15 = vsyncpa [#allocation4], 0  ;;  %s1251_s27 = smov [#allocation5]   ;;  %s20_s8 = sshll.u32 %s1369_s0, 4  ;;  %s21_s8 = int_to_ptr.hbm [resolvable:$true] %s20_s8 }
   0x4   :  { %s35_s28 = sshll.u32 %s1251_s27, 4  ;;  %s1252_s9 = smov 64   ;;  %s36_s28 = int_to_ptr.vmem [resolvable:$true] %s35_s28 }
   0x5   :  { %s1253_s10 = smov 4   ;;  %s1254_s11 = smov [#allocation2]  }
   0x6   :  { %41 = dma.hbm_to_vmem [thread:$0]  %s34_s26, 3072, %s36_s28, [#allocation6], %s1252_s9, %s1252_s9, %s1253_s10  }
   0x7   :  { %s22_s12 = sshll.u32 %s1254_s11, 4  ;;  %s1255_s1 = smov 384   ;;  %s23_s12 = int_to_ptr.vmem [resolvable:$true] %s22_s12 }
   0x8   :  { %s1256_s13 = smov 24   ;;  %s48_s16 = sshll.u32 %s1372_s3, 4  ;;  %s49_s16 = int_to_ptr.hbm [resolvable:$true] %s48_s16 }
   0x9   :  { %28 = dma.hbm_to_vmem [thread:$0]  %s21_s8, 6144, %s23_s12, [#allocation3], %s1255_s1, %s1255_s1, %s1256_s13  }
   0xa   :  { %s1257_s17 = smov [#allocation7]   ;;  %s63_s20 = sshll.u32 %s1374_s5, 4  ;;  %s64_s20 = int_to_ptr.hbm [resolvable:$true] %s63_s20 }
   0xb   :  { %s50_s0 = sshll.u32 %s1257_s17, 4  ;;  %s1258_s21 = smov [#allocation8]   ;;  %s51_s0 = int_to_ptr.vmem [resolvable:$true] %s50_s0 }
   0xc   :  { %56 = dma.hbm_to_vmem [thread:$0]  %s49_s16, 1024, %s51_s0, [#allocation6], %s1252_s9, %s1252_s9, %s1253_s10  }
   0xd   :  { %s65_s22 = sshll.u32 %s1258_s21, 4  ;;  %s66_s22 = int_to_ptr.vmem [resolvable:$true] %s65_s22 }
   0xe   :  { %71 = dma.hbm_to_vmem [thread:$0]  %s64_s20, 1024, %s66_s22, [#allocation9], %s1252_s9, %s1252_s9, %s1253_s10  }
   0xf   :  { %1243 = dma.done.wait [#allocation3], 6144  }
  0x10   :  { %1244 = vsyncadd [#allocation3], 4294961152 }
  0x11   :  { %1245 = dma.done.wait [#allocation6], 4096  }
  0x12   :  { %1246 = vsyncadd [#allocation6], 4294963200 }
  0x13   :  { %1247 = dma.done.wait [#allocation9], 1024  }
  0x14   :  { %1248 = vsyncadd [#allocation9], 4294966272  ;;  %v1007_v0 = vld [vmem:[#allocation5 + $0x38] sm:$0xff]  ;;  %v1006_v1 = vld [vmem:[#allocation5 + $0x30] sm:$0xff]  ;;  %s825_s28 = sshll.u32 %s1376_s7, 4  ;;  %s826_s28 = int_to_ptr.hbm [resolvable:$true] %s825_s28 }
  0x15   :  { %1087 = vmatpush.bf16.msra.mxu1 %v1007_v0  ;;  %1088 = vmatpush.bf16.msra.mxu2 %v1007_v0  ;;  %v1005_v2 = vld [vmem:[#allocation5 + $0x28] sm:$0xff]  ;;  %v1004_v3 = vld [vmem:[#allocation5 + $0x20] sm:$0xff]  ;;  %v1003_v4 = vld [vmem:[#allocation5 + $0x18] sm:$0xff] }
  0x16   :  { %358 = vmatpush.bf16.msra.mxu0 %v1007_v0  ;;  %1089 = vmatpush.bf16.msra.mxu3 %v1007_v0  ;;  %v1002_v5 = vld [vmem:[#allocation5 + $0x10] sm:$0xff]  ;;  %v1001_v6 = vld [vmem:[#allocation5 + $0x8] sm:$0xff]  ;;  %v1000_v7 = vld [vmem:[#allocation5] sm:$0xff] }
  0x17   :  { %v102_v8 = vld [vmem:[#allocation2 + $0x60] sm:$0xff]  ;;  %v105_v9 = vld [vmem:[#allocation2 + $0x78] sm:$0xff]  ;;  %v1022_v18 = vld [vmem:[#allocation5 + $0xb0] sm:$0xff] }
  0x18   :  { %v114_v10 = vld [vmem:[#allocation2 + $0xc0] sm:$0xff]  ;;  %v117_v11 = vld [vmem:[#allocation2 + $0xd8] sm:$0xff]  ;;  %v144_v14 = vpack.c.bf16 %v105_v9, %v102_v8  ;;  %v1014_v19 = vld [vmem:[#allocation5 + $0x70] sm:$0xff] }
  0x19   :  { %1090 = vmatpush.bf16.msra.mxu1 %v1006_v1  ;;  %1091 = vmatpush.bf16.msra.mxu2 %v1006_v1  ;;  %v1023_v12 = vld [vmem:[#allocation5 + $0xb8] sm:$0xff]  ;;  %v150_v15 = vpack.c.bf16 %v117_v11, %v114_v10  ;;  %v90_v16 = vld [vmem:[#allocation2] sm:$0xff]  ;;  %v1021_v21 = vld [vmem:[#allocation5 + $0xa8] sm:$0xff] }
  0x1a   :  { %359 = vmatpush.bf16.msra.mxu0 %v1006_v1  ;;  %1092 = vmatpush.bf16.msra.mxu3 %v1006_v1  ;;  %v1015_v13 = vld [vmem:[#allocation5 + $0x78] sm:$0xff]  ;;  %v1013_v22 = vld [vmem:[#allocation5 + $0x68] sm:$0xff]  ;;  %v1020_v23 = vld [vmem:[#allocation5 + $0xa0] sm:$0xff] }
  0x1b   :  { %v93_v17 = vld [vmem:[#allocation2 + $0x18] sm:$0xff]  ;;  %v1012_v24 = vld [vmem:[#allocation5 + $0x60] sm:$0xff]  ;;  %v108_v25 = vld [vmem:[#allocation2 + $0x90] sm:$0xff] }
  0x1c   :  { %v138_v20 = vpack.c.bf16 %v93_v17, %v90_v16  ;;  %v111_v26 = vld [vmem:[#allocation2 + $0xa8] sm:$0xff]  ;;  %v120_v27 = vld [vmem:[#allocation2 + $0xf0] sm:$0xff]  ;;  %v1019_v29 = vld [vmem:[#allocation5 + $0x98] sm:$0xff] }
  0x1d   :  { %1093 = vmatpush.bf16.msra.mxu1 %v1005_v2  ;;  %1094 = vmatpush.bf16.msra.mxu2 %v1005_v2  ;;  %v123_v28 = vld [vmem:[#allocation2 + $0x108] sm:$0xff]  ;;  %v1011_v30 = vld [vmem:[#allocation5 + $0x58] sm:$0xff]  ;;  %v147_v31 = vpack.c.bf16 %v111_v26, %v108_v25  ;;  %v96_v33 = vld [vmem:[#allocation2 + $0x30] sm:$0xff] }
  0x1e   :  { %360 = vmatpush.bf16.msra.mxu0 %v1005_v2  ;;  %1095 = vmatpush.bf16.msra.mxu3 %v1005_v2  ;;  %v153_v32 = vpack.c.bf16 %v123_v28, %v120_v27  ;;  %v99_v34 = vld [vmem:[#allocation2 + $0x48] sm:$0xff]  ;;  %v1018_v35 = vld [vmem:[#allocation5 + $0x90] sm:$0xff]  ;;  %v1016_v40 = vld [vmem:[#allocation5 + $0x80] sm:$0xff] }
  0x1f   :  { %v1010_v36 = vld [vmem:[#allocation5 + $0x50] sm:$0xff]  ;;  %v141_v37 = vpack.c.bf16 %v99_v34, %v96_v33  ;;  %v1017_v38 = vld [vmem:[#allocation5 + $0x88] sm:$0xff]  ;;  %v1008_v41 = vld [vmem:[#allocation5 + $0x40] sm:$0xff] }
  0x20   :  { %v1009_v39 = vld [vmem:[#allocation5 + $0x48] sm:$0xff]  ;;  %v94_v43 = vld [vmem:[#allocation2 + $0x20] sm:$0xff]  ;;  %v92_v44 = vld [vmem:[#allocation2 + $0x10] sm:$0xff] }
  0x21   :  { %1096 = vmatpush.bf16.msra.mxu1 %v1004_v3  ;;  %1097 = vmatpush.bf16.msra.mxu2 %v1004_v3  ;;  %v91_v42 = vld [vmem:[#allocation2 + $0x8] sm:$0xff]  ;;  %v97_v48 = vld [vmem:[#allocation2 + $0x38] sm:$0xff]  ;;  %v100_v49 = vld [vmem:[#allocation2 + $0x50] sm:$0xff] }
  0x22   :  { %361 = vmatpush.bf16.msra.mxu0 %v1004_v3  ;;  %1098 = vmatpush.bf16.msra.mxu3 %v1004_v3  ;;  %v95_v45 = vld [vmem:[#allocation2 + $0x28] sm:$0xff]  ;;  %v139_v46 = vpack.c.bf16 %v94_v43, %v91_v42  ;;  %v98_v50 = vld [vmem:[#allocation2 + $0x40] sm:$0xff]  ;;  %v101_v51 = vld [vmem:[#allocation2 + $0x58] sm:$0xff]  ;;  %v142_v52 = vpack.c.bf16 %v100_v49, %v97_v48 }
  0x23   :  { %v140_v47 = vpack.c.bf16 %v95_v45, %v92_v44  ;;  %v143_v53 = vpack.c.bf16 %v101_v51, %v98_v50  ;;  %v103_v54 = vld [vmem:[#allocation2 + $0x68] sm:$0xff]  ;;  %v106_v55 = vld [vmem:[#allocation2 + $0x80] sm:$0xff]  ;;  %v104_v56 = vld [vmem:[#allocation2 + $0x70] sm:$0xff] }
  0x24   :  { %v107_v57 = vld [vmem:[#allocation2 + $0x88] sm:$0xff]  ;;  %v145_v58 = vpack.c.bf16 %v106_v55, %v103_v54  ;;  %v109_v60 = vld [vmem:[#allocation2 + $0x98] sm:$0xff]  ;;  %v112_v61 = vld [vmem:[#allocation2 + $0xb0] sm:$0xff] }
  0x25   :  { %1099 = vmatpush.bf16.msra.mxu1 %v1003_v4  ;;  %1100 = vmatpush.bf16.msra.mxu2 %v1003_v4  ;;  %v146_v59 = vpack.c.bf16 %v107_v57, %v104_v56  ;;  %v110_v62 = vld [vmem:[#allocation2 + $0xa0] sm:$0xff]  ;;  %v113_v63 = vld [vmem:[#allocation2 + $0xb8] sm:$0xff]  ;;  %v148_v0 = vpack.c.bf16 %v112_v61, %v109_v60  ;;  %v119_v8 = vld [vmem:[#allocation2 + $0xe8] sm:$0xff] }
  0x26   :  { %362 = vmatpush.bf16.msra.mxu0 %v1003_v4  ;;  %1101 = vmatpush.bf16.msra.mxu3 %v1003_v4  ;;  %v149_v1 = vpack.c.bf16 %v113_v63, %v110_v62  ;;  %v126_v2 = vld [vmem:[#allocation2 + $0x120] sm:$0xff]  ;;  %v129_v3 = vld [vmem:[#allocation2 + $0x138] sm:$0xff]  ;;  %v132_v11 = vld [vmem:[#allocation2 + $0x150] sm:$0xff] }
  0x27   :  { %v156_v4 = vpack.c.bf16 %v129_v3, %v126_v2  ;;  %v122_v16 = vld [vmem:[#allocation2 + $0x100] sm:$0xff]  ;;  %v125_v17 = vld [vmem:[#allocation2 + $0x118] sm:$0xff]  ;;  %v128_v25 = vld [vmem:[#allocation2 + $0x130] sm:$0xff] }
  0x28   :  { %v131_v26 = vld [vmem:[#allocation2 + $0x148] sm:$0xff]  ;;  %v1026_v34 = vld [vmem:[#allocation7 + $0x10] sm:$0xff]  ;;  %v1024_v44 = vld [vmem:[#allocation7] sm:$0xff] }
  0x29   :  { %1102 = vmatpush.bf16.msra.mxu1 %v1002_v5  ;;  %1103 = vmatpush.bf16.msra.mxu2 %v1002_v5  ;;  %v158_v28 = vpack.c.bf16 %v131_v26, %v128_v25  ;;  %v1334_v50 = vld [vmem:[%s1371_s2] ss:$0 sm:$0xff] }
  0x2a   :  { %363 = vmatpush.bf16.msra.mxu0 %v1002_v5  ;;  %1104 = vmatpush.bf16.msra.mxu3 %v1002_v5  ;;  %v115_v5 = vld [vmem:[#allocation2 + $0xc8] sm:$0xff] }
  0x2d   :  { %1105 = vmatpush.bf16.msra.mxu1 %v1001_v6  ;;  %1106 = vmatpush.bf16.msra.mxu2 %v1001_v6 }
  0x2e   :  { %364 = vmatpush.bf16.msra.mxu0 %v1001_v6  ;;  %1107 = vmatpush.bf16.msra.mxu3 %v1001_v6  ;;  %v118_v6 = vld [vmem:[#allocation2 + $0xe0] sm:$0xff] }
  0x2f   :  { %v151_v9 = vpack.c.bf16 %v118_v6, %v115_v5 }
  0x31   :  { %1108 = vmatpush.bf16.msra.mxu1 %v1000_v7  ;;  %1109 = vmatpush.bf16.msra.mxu2 %v1000_v7 }
  0x32   :  { %365 = vmatpush.bf16.msra.mxu0 %v1000_v7  ;;  %1110 = vmatpush.bf16.msra.mxu3 %v1000_v7  ;;  %v116_v7 = vld [vmem:[#allocation2 + $0xd0] sm:$0xff] }
  0x33   :  { %v152_v10 = vpack.c.bf16 %v119_v8, %v116_v7 }
  0x34   :  { %376 = vmatmul.bf16.vlgmr.msra.gmra.mxu1 %v144_v14  ;;  %386 = vmatmul.bf16.vlgmr.msra.gmra.mxu2 %v150_v15  ;;  %v121_v14 = vld [vmem:[#allocation2 + $0xf8] sm:$0xff]  ;;  %v124_v15 = vld [vmem:[#allocation2 + $0x110] sm:$0xff] }
  0x35   :  { %456 = vmatpush.bf16.msrb.mxu2 %v1023_v12  ;;  %407 = vmatpush.bf16.msrb.mxu1 %v1015_v13  ;;  %v135_v12 = vld [vmem:[#allocation2 + $0x168] sm:$0xff] }
  0x36   :  { %366 = vmatmul.bf16.vlgmr.msra.gmra.mxu0 %v138_v20  ;;  %396 = vmatmul.bf16.vlgmr.msra.gmra.mxu3 %v156_v4  ;;  %v159_v13 = vpack.c.bf16 %v135_v12, %v132_v11  ;;  %v1031_v20 = vld [vmem:[#allocation7 + $0x38] sm:$0xff] }
  0x37   :  { %597 = vmatpush.bf16.msrb.mxu3 %v1031_v20 }
  0x39   :  { %457 = vmatpush.bf16.msrb.mxu2 %v1022_v18  ;;  %408 = vmatpush.bf16.msrb.mxu1 %v1014_v19  ;;  %v154_v18 = vpack.c.bf16 %v124_v15, %v121_v14  ;;  %v155_v19 = vpack.c.bf16 %v125_v17, %v122_v16 }
  0x3d   :  { %458 = vmatpush.bf16.msrb.mxu2 %v1021_v21  ;;  %409 = vmatpush.bf16.msrb.mxu1 %v1013_v22  ;;  %v1030_v21 = vld [vmem:[#allocation7 + $0x30] sm:$0xff]  ;;  %v1029_v22 = vld [vmem:[#allocation7 + $0x28] sm:$0xff] }
  0x3e   :  { %598 = vmatpush.bf16.msrb.mxu3 %v1030_v21 }
  0x41   :  { %459 = vmatpush.bf16.msrb.mxu2 %v1020_v23  ;;  %410 = vmatpush.bf16.msrb.mxu1 %v1012_v24  ;;  %v127_v23 = vld [vmem:[#allocation2 + $0x128] sm:$0xff]  ;;  %v130_v24 = vld [vmem:[#allocation2 + $0x140] sm:$0xff] }
  0x42   :  { %599 = vmatpush.bf16.msrb.mxu3 %v1029_v22  ;;  %v157_v27 = vpack.c.bf16 %v130_v24, %v127_v23 }
  0x44   :  { %381 = vmatmul.bf16.gmra.mxu1 %v147_v31  ;;  %391 = vmatmul.bf16.gmra.mxu2 %v153_v32  ;;  %v1027_v31 = vld [vmem:[#allocation7 + $0x18] sm:$0xff] }
  0x45   :  { %460 = vmatpush.bf16.msrb.mxu2 %v1019_v29  ;;  %411 = vmatpush.bf16.msrb.mxu1 %v1011_v30  ;;  %v1028_v30 = vld [vmem:[#allocation7 + $0x20] sm:$0xff] }
  0x46   :  { %371 = vmatmul.bf16.gmra.mxu0 %v141_v37  ;;  %401 = vmatmul.bf16.gmra.mxu3 %v159_v13  ;;  %v136_v37 = vld [vmem:[#allocation2 + $0x170] sm:$0xff] }
  0x47   :  { %600 = vmatpush.bf16.msrb.mxu3 %v1028_v30 }
  0x49   :  { %461 = vmatpush.bf16.msrb.mxu2 %v1018_v35  ;;  %412 = vmatpush.bf16.msrb.mxu1 %v1010_v36  ;;  %v1025_v35 = vld [vmem:[#allocation7 + $0x8] sm:$0xff]  ;;  %v133_v36 = vld [vmem:[#allocation2 + $0x158] sm:$0xff] }
  0x4b   :  { %601 = vmatpush.bf16.msrb.mxu3 %v1027_v31 }
  0x4d   :  { %462 = vmatpush.bf16.msrb.mxu2 %v1017_v38  ;;  %413 = vmatpush.bf16.msrb.mxu1 %v1009_v39  ;;  %v134_v38 = vld [vmem:[#allocation2 + $0x160] sm:$0xff]  ;;  %v137_v39 = vld [vmem:[#allocation2 + $0x178] sm:$0xff] }
  0x4e   :  { %v161_v42 = vpack.c.bf16 %v137_v39, %v134_v38 }
  0x4f   :  { %602 = vmatpush.bf16.msrb.mxu3 %v1026_v34 }
  0x51   :  { %463 = vmatpush.bf16.msrb.mxu2 %v1016_v40  ;;  %414 = vmatpush.bf16.msrb.mxu1 %v1008_v41  ;;  %v160_v41 = vpack.c.bf16 %v136_v37, %v133_v36 }
  0x53   :  { %603 = vmatpush.bf16.msrb.mxu3 %v1025_v35 }
  0x54   :  { %415 = vmatmul.bf16.vlgmr.msrb.gmra.mxu1 %v139_v46  ;;  %464 = vmatmul.bf16.vlgmr.msrb.gmra.mxu2 %v140_v47 }
  0x57   :  { %604 = vmatpush.bf16.msrb.mxu3 %v1024_v44 }
  0x64   :  { %420 = vmatmul.bf16.gmra.mxu1 %v142_v52  ;;  %469 = vmatmul.bf16.gmra.mxu2 %v143_v53 }
  0x74   :  { %425 = vmatmul.bf16.gmra.mxu1 %v145_v58  ;;  %474 = vmatmul.bf16.gmra.mxu2 %v146_v59 }
  0x84   :  { %430 = vmatmul.bf16.gmra.mxu1 %v148_v0  ;;  %479 = vmatmul.bf16.gmra.mxu2 %v149_v1 }
  0x94   :  { %435 = vmatmul.bf16.gmra.mxu1 %v151_v9  ;;  %484 = vmatmul.bf16.gmra.mxu2 %v152_v10 }
  0xa4   :  { %440 = vmatmul.bf16.gmra.mxu1 %v154_v18  ;;  %489 = vmatmul.bf16.gmra.mxu2 %v155_v19 }
  0xb1   :  { %v1321_v29 = vpop.f32.mrf.mxu1 }
  0xb2   :  { %v378_v18 = vadd.f32 %v1334_v50, %v1321_v29 }
  0xb3   :  { %v367_v47 = vpop.f32.mrf.mxu0 }
  0xb4   :  { %445 = vmatmul.bf16.gmra.mxu1 %v157_v27  ;;  %494 = vmatmul.bf16.gmra.mxu2 %v158_v28  ;;  %v368_v52 = vadd.f32 %v1334_v50, %v367_v47 }
  0xb7   :  { %v1323_v32 = vpop.f32.mrf.mxu2 }
  0xb9   :  { %v379_v33 = vpop.f32.mrf.mxu1 }
  0xba   :  { %v380_v19 = vadd.f32 %v1334_v50, %v379_v33 }
  0xbb   :  { %v369_v51 = vpop.f32.mrf.mxu0 }
  0xbc   :  { %v370_v56 = vadd.f32 %v1334_v50, %v369_v51  ;;  %v388_v51 = vadd.f32 %v1334_v50, %v1323_v32 }
  0xbf   :  { %v1325_v40 = vpop.f32.mrf.mxu2 }
  0xc1   :  { %v382_v43 = vpop.f32.mrf.mxu1 }
  0xc2   :  { %v383_v34 = vadd.f32 %v1334_v50, %v382_v43  ;;  %v390_v43 = vadd.f32 %v1334_v50, %v1325_v40 }
  0xc3   :  { %v372_v59 = vpop.f32.mrf.mxu0 }
  0xc4   :  { %450 = vmatmul.bf16.gmra.mxu1 %v160_v41  ;;  %499 = vmatmul.bf16.gmra.mxu2 %v161_v42  ;;  %v373_v2 = vadd.f32 %v1334_v50, %v372_v59 }
  0xc7   :  { %v1327_v45 = vpop.f32.mrf.mxu2 }
  0xc9   :  { %v384_v46 = vpop.f32.mrf.mxu1 }
  0xca   :  { %v385_v35 = vadd.f32 %v1334_v50, %v384_v46 }
  0xcb   :  { %v374_v4 = vpop.f32.mrf.mxu0 }
  0xcc   :  { %v375_v7 = vadd.f32 %v1334_v50, %v374_v4 }
  0xcf   :  { %v1329_v48 = vpop.f32.mrf.mxu2 }
  0xd0   :  { %v395_v32 = vadd.f32 %v1334_v50, %v1329_v48 }
  0xd1   :  { %v416_v49 = vpop.f32.mrf.mxu1 }
  0xd2   :  { %v417_v55 = vadd.f32 %v416_v49, %v368_v52 }
  0xd7   :  { %v465_v53 = vpop.f32.mrf.mxu2 }
  0xd8   :  { %v466_v57 = vadd.f32 %v465_v53, %v417_v55 }
  0xd9   :  { %v418_v54 = vpop.f32.mrf.mxu1 }
  0xda   :  { %v419_v58 = vadd.f32 %v418_v54, %v370_v56  ;;  %v505_v63 = vmax.f32 %v466_v57, 0.0 }
  0xdf   :  { %v467_v60 = vpop.f32.mrf.mxu2 }
  0xe0   :  { %v468_v61 = vadd.f32 %v467_v60, %v419_v58 }
  0xe1   :  { %v421_v62 = vpop.f32.mrf.mxu1 }
  0xe2   :  { %v506_v0 = vmax.f32 %v468_v61, 0.0  ;;  %v422_v6 = vadd.f32 %v421_v62, %v373_v2  ;;  %v393_v62 = vadd.f32 %v1334_v50, %v1327_v45  ;;  %v1038_v45 = vld [vmem:[#allocation8 + $0x30] sm:$0xff] }
  0xe4   :  { %v521_v1 = vpack.c.bf16 %v506_v0, %v505_v63  ;;  %v397_v63 = vpop.f32.mrf.mxu3 }
  0xe6   :  { %605 = vmatmul.bf16.vlgmr.msrb.gmra.mxu3 %v521_v1 }
  0xe7   :  { %v470_v3 = vpop.f32.mrf.mxu2 }
  0xe8   :  { %v471_v8 = vadd.f32 %v470_v3, %v422_v6 }
  0xe9   :  { %v423_v5 = vpop.f32.mrf.mxu1 }
  0xea   :  { %v424_v9 = vadd.f32 %v423_v5, %v375_v7  ;;  %v507_v13 = vmax.f32 %v471_v8, 0.0 }
  0xec   :  { %v399_v8 = vpop.f32.mrf.mxu3 }
  0xed   :  { %v400_v48 = vadd.f32 %v1334_v50, %v399_v8 }
  0xef   :  { %v472_v10 = vpop.f32.mrf.mxu2 }
  0xf0   :  { %v473_v11 = vadd.f32 %v472_v10, %v424_v9  ;;  %v398_v9 = vadd.f32 %v1334_v50, %v397_v63  ;;  %v1039_v10 = vld [vmem:[#allocation8 + $0x38] sm:$0xff] }
  0xf1   :  { %v426_v12 = vpop.f32.mrf.mxu1  ;;  %738 = vmatpush.bf16.msrb.mxu0 %v1039_v10 }
  0xf2   :  { %v508_v14 = vmax.f32 %v473_v11, 0.0  ;;  %v427_v20 = vadd.f32 %v426_v12, %v378_v18 }
  0xf4   :  { %v522_v15 = vpack.c.bf16 %v508_v14, %v507_v13  ;;  %v1037_v14 = vld [vmem:[#allocation8 + $0x28] sm:$0xff] }
  0xf5   :  { %739 = vmatpush.bf16.msrb.mxu0 %v1038_v45 }
  0xf6   :  { %610 = vmatmul.bf16.gmra.mxu3 %v522_v15 }
  0xf7   :  { %v475_v16 = vpop.f32.mrf.mxu2 }
  0xf8   :  { %v476_v21 = vadd.f32 %v475_v16, %v427_v20  ;;  %v1036_v20 = vld [vmem:[#allocation8 + $0x20] sm:$0xff] }
  0xf9   :  { %v428_v17 = vpop.f32.mrf.mxu1  ;;  %740 = vmatpush.bf16.msrb.mxu0 %v1037_v14 }
  0xfa   :  { %v429_v22 = vadd.f32 %v428_v17, %v380_v19  ;;  %v509_v26 = vmax.f32 %v476_v21, 0.0  ;;  %v402_v17 = vpop.f32.mrf.mxu3 }
  0xfd   :  { %741 = vmatpush.bf16.msrb.mxu0 %v1036_v20 }
  0xff   :  { %v477_v23 = vpop.f32.mrf.mxu2 }
 0x100   :  { %v478_v24 = vadd.f32 %v477_v23, %v429_v22 }
 0x101   :  { %v431_v25 = vpop.f32.mrf.mxu1 }
 0x102   :  { %v510_v27 = vmax.f32 %v478_v24, 0.0  ;;  %v432_v36 = vadd.f32 %v431_v25, %v383_v34  ;;  %v1035_v25 = vld [vmem:[#allocation8 + $0x18] sm:$0xff]  ;;  %v1034_v34 = vld [vmem:[#allocation8 + $0x10] sm:$0xff] }
 0x103   :  { %742 = vmatpush.bf16.msrb.mxu0 %v1035_v25 }
 0x104   :  { %v523_v28 = vpack.c.bf16 %v510_v27, %v509_v26  ;;  %v403_v26 = vadd.f32 %v1334_v50, %v402_v17 }
 0x106   :  { %615 = vmatmul.bf16.gmra.mxu3 %v523_v28  ;;  %v404_v28 = vpop.f32.mrf.mxu3 }
 0x107   :  { %v480_v30 = vpop.f32.mrf.mxu2  ;;  %743 = vmatpush.bf16.msrb.mxu0 %v1034_v34 }
 0x108   :  { %v481_v29 = vadd.f32 %v480_v30, %v432_v36  ;;  %v1033_v36 = vld [vmem:[#allocation8 + $0x8] sm:$0xff] }
 0x109   :  { %v433_v31 = vpop.f32.mrf.mxu1 }
 0x10a   :  { %v434_v37 = vadd.f32 %v433_v31, %v385_v35  ;;  %v511_v41 = vmax.f32 %v481_v29, 0.0  ;;  %v405_v35 = vadd.f32 %v1334_v50, %v404_v28 }
 0x10b   :  { %744 = vmatpush.bf16.msrb.mxu0 %v1033_v36 }
 0x10f   :  { %v482_v33 = vpop.f32.mrf.mxu2 }
 0x110   :  { %v483_v38 = vadd.f32 %v482_v33, %v434_v37 }
 0x111   :  { %v436_v39 = vpop.f32.mrf.mxu1 }
 0x112   :  { %v512_v42 = vmax.f32 %v483_v38, 0.0  ;;  %v437_v52 = vadd.f32 %v436_v39, %v388_v51 }
 0x114   :  { %v524_v44 = vpack.c.bf16 %v512_v42, %v511_v41  ;;  %v1032_v42 = vld [vmem:[#allocation8] sm:$0xff] }
 0x115   :  { %745 = vmatpush.bf16.msrb.mxu0 %v1032_v42 }
 0x116   :  { %620 = vmatmul.bf16.gmra.mxu3 %v524_v44 }
 0x117   :  { %v485_v47 = vpop.f32.mrf.mxu2 }
 0x118   :  { %v486_v46 = vadd.f32 %v485_v47, %v437_v52 }
 0x119   :  { %v438_v49 = vpop.f32.mrf.mxu1 }
 0x11a   :  { %v439_v53 = vadd.f32 %v438_v49, %v390_v43  ;;  %v513_v57 = vmax.f32 %v486_v46, 0.0  ;;  %v1121_v49 = vld [vmem:[%s1373_s4] ss:$0 sm:$0xff] }
 0x11f   :  { %v487_v54 = vpop.f32.mrf.mxu2 }
 0x120   :  { %v488_v55 = vadd.f32 %v487_v54, %v439_v53 }
 0x121   :  { %v441_v56 = vpop.f32.mrf.mxu1 }
 0x122   :  { %v514_v58 = vmax.f32 %v488_v55, 0.0  ;;  %v442_v40 = vadd.f32 %v441_v56, %v393_v62 }
 0x124   :  { %v525_v59 = vpack.c.bf16 %v514_v58, %v513_v57 }
 0x126   :  { %625 = vmatmul.bf16.gmra.mxu3 %v525_v59 }
 0x127   :  { %v490_v60 = vpop.f32.mrf.mxu2 }
 0x128   :  { %v491_v0 = vadd.f32 %v490_v60, %v442_v40 }
 0x129   :  { %v443_v61 = vpop.f32.mrf.mxu1 }
 0x12a   :  { %v444_v1 = vadd.f32 %v443_v61, %v395_v32  ;;  %v515_v5 = vmax.f32 %v491_v0, 0.0 }
 0x12f   :  { %v492_v2 = vpop.f32.mrf.mxu2 }
 0x130   :  { %v493_v3 = vadd.f32 %v492_v2, %v444_v1 }
 0x131   :  { %v446_v4 = vpop.f32.mrf.mxu1 }
 0x132   :  { %v516_v6 = vmax.f32 %v493_v3, 0.0  ;;  %v447_v13 = vadd.f32 %v446_v4, %v398_v9 }
 0x134   :  { %v526_v7 = vpack.c.bf16 %v516_v6, %v515_v5 }
 0x136   :  { %630 = vmatmul.bf16.gmra.mxu3 %v526_v7 }
 0x137   :  { %v495_v11 = vpop.f32.mrf.mxu2 }
 0x138   :  { %v496_v15 = vadd.f32 %v495_v11, %v447_v13 }
 0x139   :  { %v448_v12 = vpop.f32.mrf.mxu1 }
 0x13a   :  { %v449_v16 = vadd.f32 %v448_v12, %v400_v48  ;;  %v517_v22 = vmax.f32 %v496_v15, 0.0 }
 0x13f   :  { %v497_v18 = vpop.f32.mrf.mxu2 }
 0x140   :  { %v498_v19 = vadd.f32 %v497_v18, %v449_v16 }
 0x141   :  { %v451_v21 = vpop.f32.mrf.mxu1 }
 0x142   :  { %v518_v23 = vmax.f32 %v498_v19, 0.0  ;;  %v452_v30 = vadd.f32 %v451_v21, %v403_v26 }
 0x144   :  { %v527_v24 = vpack.c.bf16 %v518_v23, %v517_v22 }
 0x146   :  { %635 = vmatmul.bf16.gmra.mxu3 %v527_v24 }
 0x147   :  { %v500_v27 = vpop.f32.mrf.mxu2 }
 0x148   :  { %v501_v29 = vadd.f32 %v500_v27, %v452_v30 }
 0x149   :  { %v453_v31 = vpop.f32.mrf.mxu1 }
 0x14a   :  { %v454_v37 = vadd.f32 %v453_v31, %v405_v35  ;;  %v519_v39 = vmax.f32 %v501_v29, 0.0 }
 0x14f   :  { %v502_v33 = vpop.f32.mrf.mxu2 }
 0x150   :  { %v503_v38 = vadd.f32 %v502_v33, %v454_v37  ;;  %v1122_v33 = vld [vmem:[%s1375_s6] ss:$0 sm:$0xff]  ;;  %s1259_s6 = smov [#allocation10]  }
 0x151   :  { %s823_s25 = sshll.u32 %s1259_s6, 4  ;;  %s824_s25 = int_to_ptr.vmem [resolvable:$true] %s823_s25 }
 0x152   :  { %v520_v41 = vmax.f32 %v503_v38, 0.0 }
 0x154   :  { %v528_v44 = vpack.c.bf16 %v520_v41, %v519_v39 }
 0x156   :  { %640 = vmatmul.bf16.gmra.mxu3 %v528_v44 }
 0x169   :  { %v606_v47 = vpop.f32.mrf.mxu3 }
 0x16a   :  { %v607_v51 = vadd.f32 %v1121_v49, %v606_v47 }
 0x16c   :  { %v646_v52 = vmax.f32 %v607_v51, 0.0 }
 0x171   :  { %v608_v50 = vpop.f32.mrf.mxu3 }
 0x172   :  { %v609_v43 = vadd.f32 %v1121_v49, %v608_v50 }
 0x174   :  { %v647_v46 = vmax.f32 %v609_v43, 0.0 }
 0x176   :  { %v662_v53 = vpack.c.bf16 %v647_v46, %v646_v52 }
 0x178   :  { %746 = vmatmul.bf16.vlgmr.msrb.gmra.mxu0 %v662_v53 }
 0x179   :  { %v611_v54 = vpop.f32.mrf.mxu3 }
 0x17a   :  { %v612_v55 = vadd.f32 %v1121_v49, %v611_v54 }
 0x17c   :  { %v648_v58 = vmax.f32 %v612_v55, 0.0 }
 0x181   :  { %v613_v56 = vpop.f32.mrf.mxu3 }
 0x182   :  { %v614_v57 = vadd.f32 %v1121_v49, %v613_v56 }
 0x184   :  { %v649_v59 = vmax.f32 %v614_v57, 0.0 }
 0x186   :  { %v663_v60 = vpack.c.bf16 %v649_v59, %v648_v58 }
 0x188   :  { %751 = vmatmul.bf16.gmra.mxu0 %v663_v60 }
 0x189   :  { %v616_v61 = vpop.f32.mrf.mxu3 }
 0x18a   :  { %v617_v62 = vadd.f32 %v1121_v49, %v616_v61 }
 0x18c   :  { %v650_v40 = vmax.f32 %v617_v62, 0.0 }
 0x191   :  { %v618_v63 = vpop.f32.mrf.mxu3 }
 0x192   :  { %v619_v32 = vadd.f32 %v1121_v49, %v618_v63 }
 0x194   :  { %v651_v0 = vmax.f32 %v619_v32, 0.0 }
 0x196   :  { %v664_v1 = vpack.c.bf16 %v651_v0, %v650_v40 }
 0x198   :  { %756 = vmatmul.bf16.gmra.mxu0 %v664_v1 }
 0x199   :  { %v621_v2 = vpop.f32.mrf.mxu3 }
 0x19a   :  { %v622_v3 = vadd.f32 %v1121_v49, %v621_v2 }
 0x19c   :  { %v652_v6 = vmax.f32 %v622_v3, 0.0 }
 0x1a1   :  { %v623_v4 = vpop.f32.mrf.mxu3 }
 0x1a2   :  { %v624_v5 = vadd.f32 %v1121_v49, %v623_v4 }
 0x1a4   :  { %v653_v7 = vmax.f32 %v624_v5, 0.0 }
 0x1a6   :  { %v665_v8 = vpack.c.bf16 %v653_v7, %v652_v6 }
 0x1a8   :  { %761 = vmatmul.bf16.gmra.mxu0 %v665_v8 }
 0x1a9   :  { %v626_v9 = vpop.f32.mrf.mxu3 }
 0x1aa   :  { %v627_v10 = vadd.f32 %v1121_v49, %v626_v9 }
 0x1ac   :  { %v654_v12 = vmax.f32 %v627_v10, 0.0 }
 0x1b1   :  { %v628_v11 = vpop.f32.mrf.mxu3 }
 0x1b2   :  { %v629_v45 = vadd.f32 %v1121_v49, %v628_v11 }
 0x1b4   :  { %v655_v13 = vmax.f32 %v629_v45, 0.0 }
 0x1b6   :  { %v666_v48 = vpack.c.bf16 %v655_v13, %v654_v12 }
 0x1b8   :  { %766 = vmatmul.bf16.gmra.mxu0 %v666_v48 }
 0x1b9   :  { %v631_v14 = vpop.f32.mrf.mxu3 }
 0x1ba   :  { %v632_v15 = vadd.f32 %v1121_v49, %v631_v14 }
 0x1bc   :  { %v656_v18 = vmax.f32 %v632_v15, 0.0 }
 0x1c1   :  { %v633_v16 = vpop.f32.mrf.mxu3 }
 0x1c2   :  { %v634_v17 = vadd.f32 %v1121_v49, %v633_v16 }
 0x1c4   :  { %v657_v19 = vmax.f32 %v634_v17, 0.0 }
 0x1c6   :  { %v667_v20 = vpack.c.bf16 %v657_v19, %v656_v18 }
 0x1c8   :  { %771 = vmatmul.bf16.gmra.mxu0 %v667_v20 }
 0x1c9   :  { %v636_v21 = vpop.f32.mrf.mxu3 }
 0x1ca   :  { %v637_v22 = vadd.f32 %v1121_v49, %v636_v21 }
 0x1cc   :  { %v658_v25 = vmax.f32 %v637_v22, 0.0 }
 0x1d1   :  { %v638_v23 = vpop.f32.mrf.mxu3 }
 0x1d2   :  { %v639_v24 = vadd.f32 %v1121_v49, %v638_v23 }
 0x1d4   :  { %v659_v26 = vmax.f32 %v639_v24, 0.0 }
 0x1d6   :  { %v668_v27 = vpack.c.bf16 %v659_v26, %v658_v25 }
 0x1d8   :  { %776 = vmatmul.bf16.gmra.mxu0 %v668_v27 }
 0x1d9   :  { %v641_v28 = vpop.f32.mrf.mxu3 }
 0x1da   :  { %v642_v30 = vadd.f32 %v1121_v49, %v641_v28 }
 0x1dc   :  { %v660_v35 = vmax.f32 %v642_v30, 0.0 }
 0x1e1   :  { %v643_v31 = vpop.f32.mrf.mxu3 }
 0x1e2   :  { %v644_v34 = vadd.f32 %v1121_v49, %v643_v31 }
 0x1e4   :  { %v661_v36 = vmax.f32 %v644_v34, 0.0 }
 0x1e6   :  { %v669_v29 = vpack.c.bf16 %v661_v36, %v660_v35 }
 0x1e8   :  { %781 = vmatmul.bf16.gmra.mxu0 %v669_v29 }
 0x1f5   :  { %v747_v37 = vpop.f32.mrf.mxu0 }
 0x1f6   :  { %v748_v39 = vadd.f32 %v1122_v33, %v747_v37 }
 0x1fd   :  { %v749_v38 = vpop.f32.mrf.mxu0 }
 0x1fe   :  { %v750_v41 = vadd.f32 %v1122_v33, %v749_v38 }
 0x200   :  { %v1043_v42 = vpack.c.bf16 %v750_v41, %v748_v39 }
 0x202   :  { %1044 = vst [vmem:[#allocation10] sm:$0xff] %v1043_v42  }
 0x205   :  { %v752_v44 = vpop.f32.mrf.mxu0 }
 0x206   :  { %v753_v51 = vadd.f32 %v1122_v33, %v752_v44 }
 0x20d   :  { %v754_v47 = vpop.f32.mrf.mxu0 }
 0x20e   :  { %v755_v50 = vadd.f32 %v1122_v33, %v754_v47 }
 0x210   :  { %v1048_v43 = vpack.c.bf16 %v755_v50, %v753_v51 }
 0x212   :  { %1080 = vst [vmem:[#allocation10 + $0x8] sm:$0xff] %v1048_v43  }
 0x215   :  { %v757_v49 = vpop.f32.mrf.mxu0 }
 0x216   :  { %v758_v46 = vadd.f32 %v1122_v33, %v757_v49 }
 0x21d   :  { %v759_v52 = vpop.f32.mrf.mxu0 }
 0x21e   :  { %v760_v53 = vadd.f32 %v1122_v33, %v759_v52 }
 0x220   :  { %v1053_v54 = vpack.c.bf16 %v760_v53, %v758_v46 }
 0x222   :  { %1081 = vst [vmem:[#allocation10 + $0x10] sm:$0xff] %v1053_v54  }
 0x225   :  { %v762_v55 = vpop.f32.mrf.mxu0 }
 0x226   :  { %v763_v57 = vadd.f32 %v1122_v33, %v762_v55 }
 0x22d   :  { %v764_v56 = vpop.f32.mrf.mxu0 }
 0x22e   :  { %v765_v58 = vadd.f32 %v1122_v33, %v764_v56 }
 0x230   :  { %v1058_v59 = vpack.c.bf16 %v765_v58, %v763_v57 }
 0x232   :  { %1082 = vst [vmem:[#allocation10 + $0x18] sm:$0xff] %v1058_v59  }
 0x235   :  { %v767_v60 = vpop.f32.mrf.mxu0 }
 0x236   :  { %v768_v62 = vadd.f32 %v1122_v33, %v767_v60 }
 0x23d   :  { %v769_v61 = vpop.f32.mrf.mxu0 }
 0x23e   :  { %v770_v63 = vadd.f32 %v1122_v33, %v769_v61 }
 0x240   :  { %v1063_v32 = vpack.c.bf16 %v770_v63, %v768_v62 }
 0x242   :  { %1083 = vst [vmem:[#allocation10 + $0x20] sm:$0xff] %v1063_v32  }
 0x245   :  { %v772_v40 = vpop.f32.mrf.mxu0 }
 0x246   :  { %v773_v1 = vadd.f32 %v1122_v33, %v772_v40 }
 0x24d   :  { %v774_v0 = vpop.f32.mrf.mxu0 }
 0x24e   :  { %v775_v2 = vadd.f32 %v1122_v33, %v774_v0 }
 0x250   :  { %v1068_v3 = vpack.c.bf16 %v775_v2, %v773_v1 }
 0x252   :  { %1084 = vst [vmem:[#allocation10 + $0x28] sm:$0xff] %v1068_v3  }
 0x255   :  { %v777_v4 = vpop.f32.mrf.mxu0 }
 0x256   :  { %v778_v6 = vadd.f32 %v1122_v33, %v777_v4 }
 0x25d   :  { %v779_v5 = vpop.f32.mrf.mxu0 }
 0x25e   :  { %v780_v7 = vadd.f32 %v1122_v33, %v779_v5 }
 0x260   :  { %v1073_v8 = vpack.c.bf16 %v780_v7, %v778_v6 }
 0x262   :  { %1085 = vst [vmem:[#allocation10 + $0x30] sm:$0xff] %v1073_v8  }
 0x265   :  { %v782_v9 = vpop.f32.mrf.mxu0 }
 0x266   :  { %v783_v11 = vadd.f32 %v1122_v33, %v782_v9 }
 0x26d   :  { %v784_v10 = vpop.f32.mrf.mxu0 }
 0x26e   :  { %v785_v45 = vadd.f32 %v1122_v33, %v784_v10 }
 0x270   :  { %v1078_v12 = vpack.c.bf16 %v785_v45, %v783_v11 }
 0x272   :  { %1086 = vst [vmem:[#allocation10 + $0x38] sm:$0xff] %v1078_v12  }
 0x273   :  { %831 = dma.vmem_to_hbm [thread:$0]  %s824_s25, 1024, %s826_s28, [#allocation4], %s1252_s9, %s1252_s9, %s1253_s10  }
 0x274   :  { %1249 = dma.done.wait [#allocation4], 1024  }
 0x275   :  { %1250 = vsyncadd [#allocation4], 4294966272 }
 0x276   :  { %836 = vsyncpa [#allocation3], 1 }
 0x277   :  { %837 = vsyncpa [#allocation6], 1 }
 0x278   :  { %838 = vsyncpa [#allocation9], 1 }
 0x279   :  { %839 = vsyncpa [#allocation4], 1 }

</bundles_post_ra>
